<compile_context>
chip_gen: v5e
topology: v5e:2x2
jax: 0.10.0
libtpu: 0.0.40
codegen_flags: <defaults>
</compile_context>

<pallas_src>
import functools

import jax
import jax.numpy as jnp
from jax.experimental import pallas as pl
from jax.experimental.pallas import tpu as pltpu

_LANE = 128       # lane width: feature dims padded to this
_SUBLANE = 8      # f32 sublane packing for the batch tile


def _round_up(n, m):
    return ((n + m - 1) // m) * m


# -----------------------------------------------------------------------------
# Parameters
# -----------------------------------------------------------------------------

def init_params(key, input_dim, hidden_dim, num_layers):
    """Deterministic parameter init matching the PyTorch layer shapes.

    Weights are stored as (in, out) -- the transpose of nn.Linear's (out, in)
    -- so the kernel computes y = x @ W + b.
    """
    dims = [input_dim] + [hidden_dim] * num_layers + [1]
    params = []
    for i in range(len(dims) - 1):
        d_in, d_out = dims[i], dims[i + 1]
        key, kw, kb = jax.random.split(key, 3)
        bound = 1.0 / float(d_in) ** 0.5
        w = jax.random.uniform(kw, (d_in, d_out), jnp.float32, -bound, bound)
        b = jax.random.uniform(kb, (1, d_out), jnp.float32, -bound, bound)
        params.append((w, b))
    return params


def prepare_params(params):
    """Pad every (in, out) weight / (1, out) bias to 128-multiples and cast
    weights to bf16.  Call ONCE at init time, not per forward."""
    flat = []
    for w, b in params:
        d_in, d_out = w.shape
        in_pad = _round_up(d_in, _LANE)
        out_pad = _round_up(d_out, _LANE)
        w_p = jnp.zeros((in_pad, out_pad), jnp.float32).at[:d_in, :d_out].set(w)
        b_p = jnp.zeros((1, out_pad), jnp.float32).at[:, :d_out].set(b)
        flat.extend([w_p.astype(jnp.bfloat16), b_p])   # weights bf16, bias f32
    return tuple(flat)


# -----------------------------------------------------------------------------
# Kernel
# -----------------------------------------------------------------------------

def _make_mlp_kernel(num_linear):
    """Fused MLP kernel: args = (x_ref, w0, b0, w1, b1, ..., out_ref)."""

    def kernel(x_ref, *refs):
        out_ref = refs[-1]
        p = refs[:-1]
        h = x_ref[...]                                   # (tile_b, d_in_pad) f32
        for i in range(num_linear):
            w = p[2 * i][...]                            # (in_pad, out_pad) bf16
            b = p[2 * i + 1][...]                        # (1, out_pad)      f32
            h = jnp.dot(h.astype(jnp.bfloat16), w,
                        preferred_element_type=jnp.float32) + b
            if i < num_linear - 1:
                h = jnp.maximum(h, 0.0)                  # ReLU (dropout = identity)
        # Only column 0 of the padded result is the real scalar output.
        out_ref[...] = h[:, :1].astype(out_ref.dtype)    # narrow (tile_b, 1) store

    return kernel


def _param_spec(shape):
    # Constant index_map -> loaded once, VMEM-resident across grid steps.
    # Single-buffered so resident params cost 1x (default would be 2x).
    try:
        return pl.BlockSpec(shape, lambda i: (0, 0),
                            pipeline_mode=pl.Buffered(1))
    except Exception:  # older jax without pipeline_mode: fall back (correct, 2x VMEM)
        return pl.BlockSpec(shape, lambda i: (0, 0))


@functools.partial(jax.jit,
                   static_argnames=("num_linear", "tile_b", "vmem_limit"))
def _forward(x, flat_params, *, num_linear, tile_b, vmem_limit):
    batch, d_in = x.shape
    d_in_pad = flat_params[0].shape[0]
    b_pad = _round_up(batch, tile_b)
    if (b_pad, d_in_pad) != (batch, d_in):
        x = jnp.pad(x, ((0, b_pad - batch), (0, d_in_pad - d_in)))

    grid = (b_pad // tile_b,)
    in_specs = [pl.BlockSpec((tile_b, d_in_pad), lambda i: (i, 0))]
    for p in flat_params:
        in_specs.append(_param_spec(p.shape))
    out_specs = pl.BlockSpec((tile_b, 1), lambda i: (i, 0))

    # Advisory cost estimate for XLA's scheduler.
    flops = 0
    param_bytes = 0
    for i in range(num_linear):
        w = flat_params[2 * i]
        bias = flat_params[2 * i + 1]
        flops += 2 * b_pad * w.shape[0] * w.shape[1]
        param_bytes += int(w.size) * w.dtype.itemsize
        param_bytes += int(bias.size) * bias.dtype.itemsize
    bytes_accessed = int(x.size) * 4 + param_bytes + b_pad * 4  # narrow output

    out = pl.pallas_call(
        _make_mlp_kernel(num_linear),
        out_shape=jax.ShapeDtypeStruct((b_pad, 1), jnp.float32),
        grid=grid,
        in_specs=in_specs,
        out_specs=out_specs,
        compiler_params=pltpu.CompilerParams(
            dimension_semantics=("parallel",),
            vmem_limit_bytes=int(vmem_limit)),
        cost_estimate=pl.CostEstimate(
            flops=int(flops), transcendentals=0,
            bytes_accessed=int(bytes_accessed)),
    )(x, *flat_params)
    return out[:batch]


# -----------------------------------------------------------------------------
# Host-side sizing & wrapper
# -----------------------------------------------------------------------------

@functools.lru_cache(maxsize=1)
def _hw_budget():
    """(vmem_limit_bytes, max_tile_b) for the current TPU generation."""
    cap = None
    try:
        cap = int(pltpu.get_tpu_info().vmem_capacity_bytes)
    except Exception:
        cap = None
    if cap is None:
        try:
            kind = jax.devices()[0].device_kind.lower()
        except Exception:
            kind = ""
        # v5e / v6e: 128 MiB per core; default to the conservative 64 MiB (v7x).
        cap = (128 if ("v5" in kind or "v6" in kind) else 64) * 1024 * 1024
    limit = int(cap * 0.8)            # ~51 MiB on v7x, ~102 MiB on v5e/v6e
    max_tile_b = 512 if cap <= 64 * 1024 * 1024 else 1024
    return limit, max_tile_b


def _choose_tile_b(batch, max_tile_b, fits):
    aligned = _round_up(batch, _SUBLANE)
    if batch < 64:
        tile = min(aligned, max_tile_b)
    else:
        # Cap at ceil(batch/2) so there are >= 2 grid steps (feeds both v7x TCs).
        cap = min(max_tile_b, _round_up(-(-batch // 2), _SUBLANE))
        floor = 128 if cap >= 128 else _SUBLANE
        best = None                                 # ((b_pad, -tile), tile)
        for t in range(cap, floor - 1, -_SUBLANE):  # minimize batch-tail padding
            key = (_round_up(batch, t), -t)
            if best is None or key < best[0]:
                best = (key, t)
        tile = best[1]
    # Shrink until the VMEM estimate fits the per-generation budget.
    while tile > _SUBLANE and not fits(tile):
        tile = max(_SUBLANE, _round_up(tile // 2, _SUBLANE))
    return tile


def regression_net(x, prepared_params):
    """Forward pass matching RegressionNet (inference; dropout = identity).

    `prepared_params` is the output of prepare_params() (padded, bf16 weights).
    """
    num_linear = len(prepared_params) // 2
    batch = x.shape[0]
    d_in_pad = prepared_params[0].shape[0]
    vmem_limit, max_tile_b = _hw_budget()

    param_bytes = sum(int(p.size) * p.dtype.itemsize for p in prepared_params)
    max_width = max([d_in_pad] + [p.shape[-1] for p in prepared_params[::2]])

    def fits(tile):
        x_tiles = 2 * tile * d_in_pad * 4      # double-buffered input tile
        out_tiles = 2 * tile * 4               # double-buffered (tile, 1) output
        h_live = 2 * tile * max_width * 4      # live f32 intermediates
        return param_bytes + x_tiles + out_tiles + h_live <= 0.7 * vmem_limit

    tile_b = _choose_tile_b(batch, max_tile_b, fits)
    return _forward(x, prepared_params,
                    num_linear=num_linear, tile_b=tile_b,
                    vmem_limit=vmem_limit)


# -----------------------------------------------------------------------------
# Reference & test
# -----------------------------------------------------------------------------

def _reference_bf16(x, params):
    """Plain-JAX reference mirroring the kernel's bf16-weight / f32-acc numerics."""
    h = x
    for i, (w, b) in enumerate(params):
        h = jnp.dot(h.astype(jnp.bfloat16), w.astype(jnp.bfloat16),
                    preferred_element_type=jnp.float32) + b
        if i < len(params) - 1:
            h = jnp.maximum(h, 0.0)
    return h


def _reference_f32(x, params):
    h = x
    for i, (w, b) in enumerate(params):
        h = h @ w + b
        if i < len(params) - 1:
            h = jnp.maximum(h, 0.0)
    return h


if __name__ == "__main__":
    # Small shapes consistent with the module: batch=8, input_dim=32,
    # hidden_dim=32, num_layers=2, dropout=0.1 (identity at inference).
    batch, input_dim, hidden_dim, num_layers = 8, 32, 32, 2

    key = jax.random.PRNGKey(0)
    key_x, key_p = jax.random.split(key)
    x = jax.random.normal(key_x, (batch, input_dim), jnp.float32)
    params = init_params(key_p, input_dim, hidden_dim, num_layers)
    prepared = prepare_params(params)     # pad + bf16 once, outside the hot path

    out = regression_net(x, prepared)
    out = jax.block_until_ready(out)

    assert out.shape == (batch, 1), out.shape
    ref = _reference_bf16(x, params)
    err = float(jnp.max(jnp.abs(out - ref)))
    assert err < 1e-3, f"max abs err vs bf16 reference: {err}"
    # Loose sanity check against the pure-f32 math (bf16 weights are a small,
    # intentional numerics change).
    err32 = float(jnp.max(jnp.abs(out - _reference_f32(x, params))))
    assert err32 < 5e-2, f"max abs err vs f32 reference: {err32}"

    print("KERNEL_OK")
</pallas_src>

<mosaic_0001>
module attributes {stable_mosaic.version = 11 : i64} {
  func.func @kernel(%arg0: i32, %arg1: memref<8x128xf32, #tpu.memory_space<vmem>>, %arg2: memref<128x128xbf16, #tpu.memory_space<vmem>>, %arg3: memref<1x128xf32, #tpu.memory_space<vmem>>, %arg4: memref<128x128xbf16, #tpu.memory_space<vmem>>, %arg5: memref<1x128xf32, #tpu.memory_space<vmem>>, %arg6: memref<128x128xbf16, #tpu.memory_space<vmem>>, %arg7: memref<1x128xf32, #tpu.memory_space<vmem>>, %arg8: memref<8x1xf32, #tpu.memory_space<vmem>>) attributes {dimension_semantics = [#tpu.dimension_semantics<parallel>], iteration_bounds = array<i64: 1>, scalar_prefetch = 0 : i64, scratch_operands = 0 : i64, tpu.core_type = #tpu.core_type<tc>, window_params = [{transform_indices = @transform_0, window_bounds = array<i64: 8, 128>}, {pipeline_mode = #tpu.pipeline_mode<synchronous>, transform_indices = @transform_1, window_bounds = array<i64: 128, 128>}, {pipeline_mode = #tpu.pipeline_mode<synchronous>, transform_indices = @transform_2, window_bounds = array<i64: 1, 128>}, {pipeline_mode = #tpu.pipeline_mode<synchronous>, transform_indices = @transform_3, window_bounds = array<i64: 128, 128>}, {pipeline_mode = #tpu.pipeline_mode<synchronous>, transform_indices = @transform_4, window_bounds = array<i64: 1, 128>}, {pipeline_mode = #tpu.pipeline_mode<synchronous>, transform_indices = @transform_5, window_bounds = array<i64: 128, 128>}, {pipeline_mode = #tpu.pipeline_mode<synchronous>, transform_indices = @transform_6, window_bounds = array<i64: 1, 128>}, {transform_indices = @transform_7, window_bounds = array<i64: 8, 1>}]} {
    %c0 = arith.constant 0 : index
    %c0_0 = arith.constant 0 : index
    %0 = vector.load %arg1[%c0, %c0_0] : memref<8x128xf32, #tpu.memory_space<vmem>>, vector<8x128xf32>
    %c0_1 = arith.constant 0 : index
    %c0_2 = arith.constant 0 : index
    %1 = vector.load %arg2[%c0_1, %c0_2] : memref<128x128xbf16, #tpu.memory_space<vmem>>, vector<128x128xbf16>
    %c0_3 = arith.constant 0 : index
    %c0_4 = arith.constant 0 : index
    %2 = vector.load %arg3[%c0_3, %c0_4] : memref<1x128xf32, #tpu.memory_space<vmem>>, vector<1x128xf32>
    %3 = arith.truncf %0 : vector<8x128xf32> to vector<8x128xbf16>
    %cst = arith.constant dense<0.000000e+00> : vector<8x128xf32>
    %4 = tpu.matmul %3, %1, %cst {dimension_numbers = #tpu.dot_dimension_numbers<[1], [0], [0], [1], [0, 0, 1, 1], [], []>} : vector<8x128xbf16>, vector<128x128xbf16>, vector<8x128xf32> -> vector<8x128xf32>
    %5 = vector.broadcast %2 : vector<1x128xf32> to vector<8x128xf32>
    %6 = arith.addf %4, %5 : vector<8x128xf32>
    %cst_5 = arith.constant 0.000000e+00 : f32
    %7 = vector.broadcast %cst_5 : f32 to vector<8x128xf32>
    %8 = arith.maximumf %6, %7 : vector<8x128xf32>
    %c0_6 = arith.constant 0 : index
    %c0_7 = arith.constant 0 : index
    %9 = vector.load %arg4[%c0_6, %c0_7] : memref<128x128xbf16, #tpu.memory_space<vmem>>, vector<128x128xbf16>
    %c0_8 = arith.constant 0 : index
    %c0_9 = arith.constant 0 : index
    %10 = vector.load %arg5[%c0_8, %c0_9] : memref<1x128xf32, #tpu.memory_space<vmem>>, vector<1x128xf32>
    %11 = arith.truncf %8 : vector<8x128xf32> to vector<8x128xbf16>
    %cst_10 = arith.constant dense<0.000000e+00> : vector<8x128xf32>
    %12 = tpu.matmul %11, %9, %cst_10 {dimension_numbers = #tpu.dot_dimension_numbers<[1], [0], [0], [1], [0, 0, 1, 1], [], []>} : vector<8x128xbf16>, vector<128x128xbf16>, vector<8x128xf32> -> vector<8x128xf32>
    %13 = vector.broadcast %10 : vector<1x128xf32> to vector<8x128xf32>
    %14 = arith.addf %12, %13 : vector<8x128xf32>
    %cst_11 = arith.constant 0.000000e+00 : f32
    %15 = vector.broadcast %cst_11 : f32 to vector<8x128xf32>
    %16 = arith.maximumf %14, %15 : vector<8x128xf32>
    %c0_12 = arith.constant 0 : index
    %c0_13 = arith.constant 0 : index
    %17 = vector.load %arg6[%c0_12, %c0_13] : memref<128x128xbf16, #tpu.memory_space<vmem>>, vector<128x128xbf16>
    %c0_14 = arith.constant 0 : index
    %c0_15 = arith.constant 0 : index
    %18 = vector.load %arg7[%c0_14, %c0_15] : memref<1x128xf32, #tpu.memory_space<vmem>>, vector<1x128xf32>
    %19 = arith.truncf %16 : vector<8x128xf32> to vector<8x128xbf16>
    %cst_16 = arith.constant dense<0.000000e+00> : vector<8x128xf32>
    %20 = tpu.matmul %19, %17, %cst_16 {dimension_numbers = #tpu.dot_dimension_numbers<[1], [0], [0], [1], [0, 0, 1, 1], [], []>} : vector<8x128xbf16>, vector<128x128xbf16>, vector<8x128xf32> -> vector<8x128xf32>
    %21 = vector.broadcast %18 : vector<1x128xf32> to vector<8x128xf32>
    %22 = arith.addf %20, %21 : vector<8x128xf32>
    %23 = vector.extract_strided_slice %22 {offsets = [0, 0], sizes = [8, 1], strides = [1, 1]} : vector<8x128xf32> to vector<8x1xf32>
    %c0_17 = arith.constant 0 : index
    %c0_18 = arith.constant 0 : index
    %24 = vector.load %arg8[%c0_17, %c0_18] : memref<8x1xf32, #tpu.memory_space<vmem>>, vector<8x1xf32>
    tpu.vector_store %arg8[%c0_17, %c0_18], %23 {strides = array<i32>} : memref<8x1xf32, #tpu.memory_space<vmem>>, vector<8x1xf32>,
    return
  }
  func.func @transform_0(%arg0: i32) -> (i32, i32) {
    %c0_i32 = arith.constant 0 : i32
    %c0_i32_0 = arith.constant 0 : i32
    return %arg0, %c0_i32 : i32, i32
  }
  func.func @transform_1(%arg0: i32) -> (i32, i32) {
    %c0_i32 = arith.constant 0 : i32
    %c0_i32_0 = arith.constant 0 : i32
    %c0_i32_1 = arith.constant 0 : i32
    return %c0_i32, %c0_i32_0 : i32, i32
  }
  func.func @transform_2(%arg0: i32) -> (i32, i32) {
    %c0_i32 = arith.constant 0 : i32
    %c0_i32_0 = arith.constant 0 : i32
    %c0_i32_1 = arith.constant 0 : i32
    return %c0_i32, %c0_i32_0 : i32, i32
  }
  func.func @transform_3(%arg0: i32) -> (i32, i32) {
    %c0_i32 = arith.constant 0 : i32
    %c0_i32_0 = arith.constant 0 : i32
    %c0_i32_1 = arith.constant 0 : i32
    return %c0_i32, %c0_i32_0 : i32, i32
  }
  func.func @transform_4(%arg0: i32) -> (i32, i32) {
    %c0_i32 = arith.constant 0 : i32
    %c0_i32_0 = arith.constant 0 : i32
    %c0_i32_1 = arith.constant 0 : i32
    return %c0_i32, %c0_i32_0 : i32, i32
  }
  func.func @transform_5(%arg0: i32) -> (i32, i32) {
    %c0_i32 = arith.constant 0 : i32
    %c0_i32_0 = arith.constant 0 : i32
    %c0_i32_1 = arith.constant 0 : i32
    return %c0_i32, %c0_i32_0 : i32, i32
  }
  func.func @transform_6(%arg0: i32) -> (i32, i32) {
    %c0_i32 = arith.constant 0 : i32
    %c0_i32_0 = arith.constant 0 : i32
    %c0_i32_1 = arith.constant 0 : i32
    return %c0_i32, %c0_i32_0 : i32, i32
  }
  func.func @transform_7(%arg0: i32) -> (i32, i32) {
    %c0_i32 = arith.constant 0 : i32
    %c0_i32_0 = arith.constant 0 : i32
    return %arg0, %c0_i32 : i32, i32
  }
}

</mosaic_0001>

<bundles_post_ra>
// kernel: _forward.1
= control target key start
LH: loop header
LB: loop body
LE: loop exit
PB: predicated region body
PF: predicated region fallthrough
CT: control target
= control target key end

     0   :  { %12 = vsyncpa [#allocation3], 0  ;;  %s603_s0 = inlined_call_operand.vmem [shape: f32[8,128], index: 0, kind: input, shape index: {}]   ;;  %s604_s1 = inlined_call_operand.hbm [shape: bf16[128,128], index: 1, kind: input, shape index: {}]   ;;  %s605_s2 = inlined_call_operand.vmem [shape: f32[1,128], index: 2, kind: input, shape index: {}]   ;;  %s606_s3 = inlined_call_operand.hbm [shape: bf16[128,128], index: 3, kind: input, shape index: {}]   ;;  %s607_s4 = inlined_call_operand.vmem [shape: f32[1,128], index: 4, kind: input, shape index: {}]   ;;  %s608_s5 = inlined_call_operand.hbm [shape: bf16[128,128], index: 5, kind: input, shape index: {}]   ;;  %s609_s6 = inlined_call_operand.vmem [shape: f32[1,128], index: 6, kind: input, shape index: {}]   ;;  %s610_s7 = inlined_call_operand.vmem [shape: f32[8,1], index: 7, kind: output, shape index: {}]  }
   0x1   :  { %13 = vsyncpa [#allocation5], 0  ;;  %s35_s26 = sshll.u32 %s606_s3, 4  ;;  %s534_s27 = smov [#allocation4]   ;;  %s36_s26 = int_to_ptr.hbm [resolvable:$true] %s35_s26 }
   0x2   :  { %s37_s28 = sshll.u32 %s534_s27, 4  ;;  %s20_s8 = sshll.u32 %s604_s1, 4  ;;  %s38_s28 = int_to_ptr.vmem [resolvable:$true] %s37_s28  ;;  %s21_s8 = int_to_ptr.hbm [resolvable:$true] %s20_s8 }
   0x3   :  { %s535_s9 = smov 64   ;;  %s536_s10 = smov 4  }
   0x4   :  { %43 = dma.hbm_to_vmem [thread:$0]  %s36_s26, 1024, %s38_s28, [#allocation5], %s535_s9, %s535_s9, %s536_s10  }
   0x5   :  { %s537_s11 = smov [#allocation2]   ;;  %s50_s15 = sshll.u32 %s608_s5, 4  ;;  %s51_s15 = int_to_ptr.hbm [resolvable:$true] %s50_s15 }
   0x6   :  { %s22_s12 = sshll.u32 %s537_s11, 4  ;;  %s538_s3 = smov [#allocation6]   ;;  %s23_s12 = int_to_ptr.vmem [resolvable:$true] %s22_s12 }
   0x7   :  { %28 = dma.hbm_to_vmem [thread:$0]  %s21_s8, 1024, %s23_s12, [#allocation3], %s535_s9, %s535_s9, %s536_s10  }
   0x8   :  { %s52_s16 = sshll.u32 %s538_s3, 4  ;;  %s53_s16 = int_to_ptr.vmem [resolvable:$true] %s52_s16 }
   0x9   :  { %58 = dma.hbm_to_vmem [thread:$0]  %s51_s15, 1024, %s53_s16, [#allocation5], %s535_s9, %s535_s9, %s536_s10  }
   0xa   :  { %530 = dma.done.wait [#allocation3], 1024  }
   0xb   :  { %531 = vsyncadd [#allocation3], 4294966272 }
   0xc   :  { %532 = dma.done.wait [#allocation5], 2048  }
   0xd   :  { %533 = vsyncadd [#allocation5], 4294965248  ;;  %v433_v0 = vld [vmem:[#allocation2 + $0x38] sm:$0xff]  ;;  %v432_v1 = vld [vmem:[#allocation2 + $0x30] sm:$0xff]  ;;  %vm322_vm0 = vcmask 7168  }
   0xe   :  { %143 = vmatpush.bf16.msra.mxu0 %v433_v0  ;;  %v441_v2 = vld [vmem:[#allocation4 + $0x38] sm:$0xff]  ;;  %v440_v3 = vld [vmem:[#allocation4 + $0x30] sm:$0xff]  ;;  %v431_v4 = vld [vmem:[#allocation2 + $0x28] sm:$0xff] }
   0xf   :  { %226 = vmatpush.bf16.msra.mxu1 %v441_v2  ;;  %v439_v5 = vld [vmem:[#allocation4 + $0x28] sm:$0xff]  ;;  %v430_v6 = vld [vmem:[#allocation2 + $0x20] sm:$0xff]  ;;  %v429_v8 = vld [vmem:[#allocation2 + $0x18] sm:$0xff] }
  0x10   :  { %v438_v7 = vld [vmem:[#allocation4 + $0x20] sm:$0xff]  ;;  %v437_v9 = vld [vmem:[#allocation4 + $0x18] sm:$0xff]  ;;  %v428_v10 = vld [vmem:[#allocation2 + $0x10] sm:$0xff] }
  0x11   :  { %v436_v11 = vld [vmem:[#allocation4 + $0x10] sm:$0xff]  ;;  %v427_v12 = vld [vmem:[#allocation2 + $0x8] sm:$0xff]  ;;  %v426_v13 = vld [vmem:[#allocation2] sm:$0xff] }
  0x12   :  { %144 = vmatpush.bf16.msra.mxu0 %v432_v1  ;;  %v73_v14 = vld [vmem:[%s603_s0] sm:$0xff]  ;;  %v435_v16 = vld [vmem:[#allocation4 + $0x8] sm:$0xff]  ;;  %v449_v18 = vld [vmem:[#allocation6 + $0x38] sm:$0xff] }
  0x13   :  { %227 = vmatpush.bf16.msra.mxu1 %v440_v3  ;;  %v91_v15 = vpack.c.bf16 %v73_v14, %v73_v14  ;;  %v434_v17 = vld [vmem:[#allocation4] sm:$0xff]  ;;  %309 = vmatpush.bf16.msra.mxu2 %v449_v18  ;;  %v448_v19 = vld [vmem:[#allocation6 + $0x30] sm:$0xff]  ;;  %v447_v20 = vld [vmem:[#allocation6 + $0x28] sm:$0xff] }
  0x14   :  { %v446_v21 = vld [vmem:[#allocation6 + $0x20] sm:$0xff]  ;;  %v445_v22 = vld [vmem:[#allocation6 + $0x18] sm:$0xff]  ;;  %v444_v23 = vld [vmem:[#allocation6 + $0x10] sm:$0xff] }
  0x15   :  { %v455_v24 = vld [vmem:[%s605_s2] ss:$0 sm:$0xff]  ;;  %v443_v30 = vld [vmem:[#allocation6 + $0x8] sm:$0xff] }
  0x16   :  { %145 = vmatpush.bf16.msra.mxu0 %v431_v4  ;;  %v442_v31 = vld [vmem:[#allocation6] sm:$0xff] }
  0x17   :  { %228 = vmatpush.bf16.msra.mxu1 %v439_v5  ;;  %310 = vmatpush.bf16.msra.mxu2 %v448_v19  ;;  %v456_v32 = vld [vmem:[%s607_s4] ss:$0 sm:$0xff] }
  0x18   :  { %v457_v38 = vld [vmem:[%s609_s6] ss:$0 sm:$0xff] }
  0x1a   :  { %146 = vmatpush.bf16.msra.mxu0 %v430_v6 }
  0x1b   :  { %229 = vmatpush.bf16.msra.mxu1 %v438_v7  ;;  %311 = vmatpush.bf16.msra.mxu2 %v447_v20 }
  0x1e   :  { %147 = vmatpush.bf16.msra.mxu0 %v429_v8 }
  0x1f   :  { %230 = vmatpush.bf16.msra.mxu1 %v437_v9  ;;  %312 = vmatpush.bf16.msra.mxu2 %v446_v21 }
  0x22   :  { %148 = vmatpush.bf16.msra.mxu0 %v428_v10 }
  0x23   :  { %231 = vmatpush.bf16.msra.mxu1 %v436_v11  ;;  %313 = vmatpush.bf16.msra.mxu2 %v445_v22 }
  0x26   :  { %149 = vmatpush.bf16.msra.mxu0 %v427_v12 }
  0x27   :  { %232 = vmatpush.bf16.msra.mxu1 %v435_v16  ;;  %314 = vmatpush.bf16.msra.mxu2 %v444_v23 }
  0x2a   :  { %150 = vmatpush.bf16.msra.mxu0 %v426_v13 }
  0x2b   :  { %233 = vmatpush.bf16.msra.mxu1 %v434_v17  ;;  %315 = vmatpush.bf16.msra.mxu2 %v443_v30 }
  0x2d   :  { %151 = vmatmul.bf16.vlgmr.msra.gmra.mxu0 %v91_v15 }
  0x2f   :  { %316 = vmatpush.bf16.msra.mxu2 %v442_v31 }
  0xaa   :  { %v152_v25 = vpop.f32.mrf.mxu0 }
  0xab   :  { %v153_v26 = vadd.f32 %v455_v24, %v152_v25 }
  0xad   :  { %v156_v27 = vmax.f32 %v153_v26, 0.0 }
  0xaf   :  { %v174_v28 = vpack.c.bf16 %v156_v27, %v156_v27 }
  0xb1   :  { %234 = vmatmul.bf16.vlgmr.msra.gmra.mxu1 %v174_v28 }
  0xb2   :  { %v154_v29 = vpop.f32.mrf.mxu0 }
 0x12e   :  { %v235_v33 = vpop.f32.mrf.mxu1 }
 0x12f   :  { %v236_v34 = vadd.f32 %v456_v32, %v235_v33 }
 0x131   :  { %v239_v35 = vmax.f32 %v236_v34, 0.0 }
 0x133   :  { %v257_v36 = vpack.c.bf16 %v239_v35, %v239_v35 }
 0x135   :  { %317 = vmatmul.bf16.vlgmr.msra.gmra.mxu2 %v257_v36 }
 0x136   :  { %v237_v37 = vpop.f32.mrf.mxu1 }
 0x1b8   :  { %v318_v39 = vpop.f32.mrf.mxu2 }
 0x1b9   :  { %v319_v40 = vadd.f32 %v457_v38, %v318_v39 }
 0x1bb   :  { %323 = vst.msk [vmem:[%s610_s7] sm:$0xff] %vm322_vm0, %v319_v40 }
 0x1c0   :  { %v320_v41 = vpop.f32.mrf.mxu2 }
 0x1c1   :  { %328 = vsyncpa [#allocation3], 1 }
 0x1c2   :  { %329 = vsyncpa [#allocation5], 1 }

</bundles_post_ra>
